<compile_context>
chip_gen: v5e
topology: v5e:2x2
jax: 0.10.0
libtpu: 0.0.40
codegen_flags: <defaults>
</compile_context>

<pallas_src>
import numpy as np
import jax
import jax.numpy as jnp
from jax.experimental import pallas as pl
from jax.experimental.pallas import tpu as pltpu


def _round_up(a, m):
    return -(-a // m) * m


def _resnet_kernel(x_ref, w1_ref, b1_ref, w2_ref, b2_ref, o_ref):
    x = x_ref[...]            # (TM, Dp) f32 batch tile (packed rows)
    w1 = w1_ref[...]          # (Dp, Hp) f32 or bf16 (MXU operand dtype), block-diagonal
    w2 = w2_ref[...]          # (Hp, Dp)
    b1 = b1_ref[...]          # (1, Hp) f32 — VMEM-resident, loaded once per tile
    b2 = b2_ref[...]          # (1, Dp) f32
    mx_dtype = w1.dtype       # matmul operand dtype (f32, or bf16 on v6e/v7x)

    a = jnp.tanh(x)           # elementwise/EUP work stays f32 (v5e has no bf16 VPU/EUP)
    hid = jnp.tanh(
        jnp.dot(a.astype(mx_dtype), w1, preferred_element_type=jnp.float32) + b1
    )
    y = jnp.dot(hid.astype(mx_dtype), w2, preferred_element_type=jnp.float32) + b2
    o_ref[...] = x + y        # residual add in f32


def resnet_forward(x, w1, b1, w2, b2, dt=0.1, *, tm=512, mxu_dtype=jnp.float32):
    """out = Lin2(tanh(Lin1(tanh(x)))) + x, tiled over the (packed) batch dimension.

    x: (N, D); w1: (D, H); b1: (H,); w2: (H, D); b2: (D,).
    Weights are stored (in_features, out_features), i.e. PyTorch weight transposed.
    """
    # TODO(synk): non-'uniform' time_lag branch (concatenating dt onto the input) is not
    # implemented; for the default 'uniform' model dt is unused.
    del dt

    N, D = x.shape
    Din, H = w1.shape
    assert Din == D and w2.shape == (H, D) and b1.shape == (H,) and b2.shape == (D,)

    pack = 128 // D if (D <= 128 and 128 % D == 0) else 1

    if pack >= 1 and 128 % max(D, 1) == 0 and D <= 128 and N % pack == 0:
        # ---- Packed path (no feature zero-padding, no batch padding) -----------------
        # Each packed row holds `pack` original rows; block-diagonal weights keep the
        # per-row math exact, tanh / residual are elementwise so packing is transparent.
        n_rows = N // pack
        Dp = D * pack                      # lane-dense (== 128 when pack > 1)
        Hp = H * pack
        xp = x.astype(jnp.float32).reshape(n_rows, Dp)   # contiguous reshape: free
        eye = jnp.eye(pack, dtype=jnp.float32)
        w1p = jnp.kron(eye, w1.astype(jnp.float32)).astype(mxu_dtype)   # (Dp, Hp) block-diag
        w2p = jnp.kron(eye, w2.astype(jnp.float32)).astype(mxu_dtype)   # (Hp, Dp) block-diag
        b1p = jnp.tile(b1.astype(jnp.float32), pack).reshape(1, Hp)
        b2p = jnp.tile(b2.astype(jnp.float32), pack).reshape(1, Dp)
        unpack = lambda o: o.reshape(N, D)               # free reshape back
    else:
        # ---- Fallback: zero-pad features to lane-dense multiples of 128 --------------
        n_rows = N
        Dp = _round_up(D, 128)
        Hp = _round_up(H, 128)
        xp = jnp.pad(x.astype(jnp.float32), ((0, 0), (0, Dp - D)))
        w1p = jnp.pad(w1.astype(jnp.float32), ((0, Dp - D), (0, Hp - H))).astype(mxu_dtype)
        w2p = jnp.pad(w2.astype(jnp.float32), ((0, Hp - H), (0, Dp - D))).astype(mxu_dtype)
        b1p = jnp.pad(b1.astype(jnp.float32), (0, Hp - H)).reshape(1, Hp)
        b2p = jnp.pad(b2.astype(jnp.float32), (0, Dp - D)).reshape(1, Dp)
        unpack = lambda o: o[:, :D]

    # Batch tile: as large as requested, but keep >= 2 grid steps when possible so both
    # v7x TensorCores are fed; round to the 8-sublane granule.  Ragged tails become
    # partial blocks (rows are independent, so this is safe).
    tm_cap = max(8, _round_up(pl.cdiv(n_rows, 2), 8))
    tm_eff = max(8, min(_round_up(tm, 8), tm_cap))
    grid = (pl.cdiv(n_rows, tm_eff),)

    w_bytes = np.dtype(mxu_dtype).itemsize
    cost = pl.CostEstimate(
        flops=4 * n_rows * Dp * Hp,                       # two (n_rows,Dp)x(Dp,Hp)-class matmuls
        transcendentals=n_rows * (Dp + Hp),               # tanh(x) and tanh(hidden)
        bytes_accessed=2 * n_rows * Dp * 4                # stream x in, out back
        + 2 * Dp * Hp * w_bytes + (Hp + Dp) * 4,          # resident weights + biases
    )

    out = pl.pallas_call(
        _resnet_kernel,
        out_shape=jax.ShapeDtypeStruct((n_rows, Dp), jnp.float32),
        grid_spec=pltpu.PrefetchScalarGridSpec(
            num_scalar_prefetch=0,
            grid=grid,
            in_specs=[
                pl.BlockSpec((tm_eff, Dp), lambda i: (i, 0)),  # x: streamed per batch tile
                pl.BlockSpec((Dp, Hp), lambda i: (0, 0)),      # w1: VMEM-resident
                pl.BlockSpec((1, Hp), lambda i: (0, 0)),       # b1: VMEM-resident
                pl.BlockSpec((Hp, Dp), lambda i: (0, 0)),      # w2: VMEM-resident
                pl.BlockSpec((1, Dp), lambda i: (0, 0)),       # b2: VMEM-resident
            ],
            out_specs=pl.BlockSpec((tm_eff, Dp), lambda i: (i, 0)),
        ),
        compiler_params=pltpu.CompilerParams(
            dimension_semantics=("parallel",),   # batch tiles across both TCs on v7x
        ),
        # Safe because in/out index maps are identical per grid step (read-before-write).
        input_output_aliases={0: 0},
        cost_estimate=cost,
    )(xp, w1p, b1p, w2p, b2p)

    return unpack(out)


def resnet_reference(x, w1, b1, w2, b2):
    a = jnp.tanh(x)
    hid = jnp.tanh(a @ w1 + b1)
    y = hid @ w2 + b2
    return x + y


if __name__ == "__main__":
    # layers = [D, H, D] -> two Linear layers; activation = Tanh everywhere.
    # N=256, D=H=32: packed to (64, 128) rows -> two 32-row tiles (grid of 2).
    N, D, H = 256, 32, 32

    key = jax.random.PRNGKey(0)
    kx, kw1, kw2 = jax.random.split(key, 3)

    x = jax.random.normal(kx, (N, D), dtype=jnp.float32)
    # nn.init.normal_(weight, 0, 1), zero bias (weights stored as (in, out)).
    w1 = jax.random.normal(kw1, (D, H), dtype=jnp.float32)
    b1 = jnp.zeros((H,), dtype=jnp.float32)
    w2 = jax.random.normal(kw2, (H, D), dtype=jnp.float32)
    b2 = jnp.zeros((D,), dtype=jnp.float32)

    # Reference computed before the call because x is donated below.
    ref = resnet_reference(x, w1, b1, w2, b2)

    # Donate x so input_output_aliases={0:0} reuses the real input HBM buffer.
    fwd = jax.jit(resnet_forward, donate_argnums=(0,))
    out = jax.block_until_ready(fwd(x, w1, b1, w2, b2))

    assert out.shape == (N, D)
    assert jnp.allclose(out, ref, atol=1e-4, rtol=1e-4), "mismatch vs reference"

    print("KERNEL_OK")
</pallas_src>

<mosaic_0001>
module attributes {stable_mosaic.version = 11 : i64} {
  func.func @_resnet_kernel(%arg0: i32, %arg1: memref<32x128xf32, #tpu.memory_space<vmem>>, %arg2: memref<128x128xf32, #tpu.memory_space<vmem>>, %arg3: memref<1x128xf32, #tpu.memory_space<vmem>>, %arg4: memref<128x128xf32, #tpu.memory_space<vmem>>, %arg5: memref<1x128xf32, #tpu.memory_space<vmem>>, %arg6: memref<32x128xf32, #tpu.memory_space<vmem>>) attributes {dimension_semantics = [#tpu.dimension_semantics<parallel>], iteration_bounds = array<i64: 2>, scalar_prefetch = 0 : i64, scratch_operands = 0 : i64, tpu.core_type = #tpu.core_type<tc>, window_params = [{transform_indices = @transform_0, window_bounds = array<i64: 32, 128>}, {pipeline_mode = #tpu.pipeline_mode<synchronous>, transform_indices = @transform_1, window_bounds = array<i64: 128, 128>}, {pipeline_mode = #tpu.pipeline_mode<synchronous>, transform_indices = @transform_2, window_bounds = array<i64: 1, 128>}, {pipeline_mode = #tpu.pipeline_mode<synchronous>, transform_indices = @transform_3, window_bounds = array<i64: 128, 128>}, {pipeline_mode = #tpu.pipeline_mode<synchronous>, transform_indices = @transform_4, window_bounds = array<i64: 1, 128>}, {transform_indices = @transform_5, window_bounds = array<i64: 32, 128>}]} {
    %c0 = arith.constant 0 : index
    %c0_0 = arith.constant 0 : index
    %0 = vector.load %arg1[%c0, %c0_0] : memref<32x128xf32, #tpu.memory_space<vmem>>, vector<32x128xf32>
    %c0_1 = arith.constant 0 : index
    %c0_2 = arith.constant 0 : index
    %1 = vector.load %arg2[%c0_1, %c0_2] : memref<128x128xf32, #tpu.memory_space<vmem>>, vector<128x128xf32>
    %c0_3 = arith.constant 0 : index
    %c0_4 = arith.constant 0 : index
    %2 = vector.load %arg4[%c0_3, %c0_4] : memref<128x128xf32, #tpu.memory_space<vmem>>, vector<128x128xf32>
    %c0_5 = arith.constant 0 : index
    %c0_6 = arith.constant 0 : index
    %3 = vector.load %arg3[%c0_5, %c0_6] : memref<1x128xf32, #tpu.memory_space<vmem>>, vector<1x128xf32>
    %c0_7 = arith.constant 0 : index
    %c0_8 = arith.constant 0 : index
    %4 = vector.load %arg5[%c0_7, %c0_8] : memref<1x128xf32, #tpu.memory_space<vmem>>, vector<1x128xf32>
    %5 = math.tanh %0 : vector<32x128xf32>
    %cst = arith.constant dense<0.000000e+00> : vector<32x128xf32>
    %6 = tpu.matmul %5, %1, %cst {dimension_numbers = #tpu.dot_dimension_numbers<[1], [0], [0], [1], [0, 0, 1, 1], [], []>} : vector<32x128xf32>, vector<128x128xf32>, vector<32x128xf32> -> vector<32x128xf32>
    %7 = vector.broadcast %3 : vector<1x128xf32> to vector<32x128xf32>
    %8 = arith.addf %6, %7 : vector<32x128xf32>
    %9 = math.tanh %8 : vector<32x128xf32>
    %cst_9 = arith.constant dense<0.000000e+00> : vector<32x128xf32>
    %10 = tpu.matmul %9, %2, %cst_9 {dimension_numbers = #tpu.dot_dimension_numbers<[1], [0], [0], [1], [0, 0, 1, 1], [], []>} : vector<32x128xf32>, vector<128x128xf32>, vector<32x128xf32> -> vector<32x128xf32>
    %11 = vector.broadcast %4 : vector<1x128xf32> to vector<32x128xf32>
    %12 = arith.addf %10, %11 : vector<32x128xf32>
    %13 = arith.addf %0, %12 : vector<32x128xf32>
    %c0_10 = arith.constant 0 : index
    %c0_11 = arith.constant 0 : index
    %14 = vector.load %arg6[%c0_10, %c0_11] : memref<32x128xf32, #tpu.memory_space<vmem>>, vector<32x128xf32>
    tpu.vector_store %arg6[%c0_10, %c0_11], %13 {strides = array<i32>} : memref<32x128xf32, #tpu.memory_space<vmem>>, vector<32x128xf32>,
    return
  }
  func.func @transform_0(%arg0: i32) -> (i32, i32) {
    %c0_i32 = arith.constant 0 : i32
    %c0_i32_0 = arith.constant 0 : i32
    return %arg0, %c0_i32 : i32, i32
  }
  func.func @transform_1(%arg0: i32) -> (i32, i32) {
    %c0_i32 = arith.constant 0 : i32
    %c0_i32_0 = arith.constant 0 : i32
    %c0_i32_1 = arith.constant 0 : i32
    return %c0_i32, %c0_i32_0 : i32, i32
  }
  func.func @transform_2(%arg0: i32) -> (i32, i32) {
    %c0_i32 = arith.constant 0 : i32
    %c0_i32_0 = arith.constant 0 : i32
    %c0_i32_1 = arith.constant 0 : i32
    return %c0_i32, %c0_i32_0 : i32, i32
  }
  func.func @transform_3(%arg0: i32) -> (i32, i32) {
    %c0_i32 = arith.constant 0 : i32
    %c0_i32_0 = arith.constant 0 : i32
    %c0_i32_1 = arith.constant 0 : i32
    return %c0_i32, %c0_i32_0 : i32, i32
  }
  func.func @transform_4(%arg0: i32) -> (i32, i32) {
    %c0_i32 = arith.constant 0 : i32
    %c0_i32_0 = arith.constant 0 : i32
    %c0_i32_1 = arith.constant 0 : i32
    return %c0_i32, %c0_i32_0 : i32, i32
  }
  func.func @transform_5(%arg0: i32) -> (i32, i32) {
    %c0_i32 = arith.constant 0 : i32
    %c0_i32_0 = arith.constant 0 : i32
    return %arg0, %c0_i32 : i32, i32
  }
}

</mosaic_0001>

<bundles_post_ra>
// kernel: tile.13
= control target key start
LH: loop header
LB: loop body
LE: loop exit
PB: predicated region body
PF: predicated region fallthrough
CT: control target
= control target key end

     0   :  { %s22_s0 = inlined_call_operand.vmem [shape: f32[32], index: 0, kind: input, shape index: {}]   ;;  %s23_s1 = inlined_call_operand.vmem [shape: f32[4,32], index: 1, kind: output, shape index: {}]  }
   0x1   :  { %v4_v0 = vld [vmem:[%s22_s0] ss:$0 sm:$0xff] }
   0x2   :  { %5 = vst [vmem:[%s23_s1] sm:$0xf] %v4_v0 }

// kernel: tile.14
= control target key start
LH: loop header
LB: loop body
LE: loop exit
PB: predicated region body
PF: predicated region fallthrough
CT: control target
= control target key end

     0   :  { %s37_s8 = smov 32   ;;  %s38_s9 = smov 64   ;;  %vm7_vm0 = vcmask 261120   ;;  %vm13_vm1 = vcmask 1048320   ;;  %vm19_vm2 = vcmask 785920   ;;  %vm25_vm3 = vcmask 523520   ;;  %s55_s0 = inlined_call_operand.vmem [shape: f32[4,32], index: 0, kind: input, shape index: {}]   ;;  %s56_s1 = inlined_call_operand.vmem [shape: f32[1,128], index: 1, kind: output, shape index: {}]  }
   0x1   :  { %v4_v0 = vld [vmem:[%s55_s0] sm:$0xf]  ;;  %s36_s0 = smov 96  }
   0x2   :  { %5 = vst [vmem:[#allocation1] sm:$0xf] %v4_v0 }
   0x9   :  { %v10_v1 = vld [vmem:[#allocation1 + $0x3] sm:$0x1]   ;;  %v22_v2 = vld [vmem:[#allocation1 + $0x1] sm:$0x1]   ;;  %v16_v3 = vld [vmem:[#allocation1 + $0x2] sm:$0x1]  }
   0xa   :  { %11 = vrot.lane.b32.xlu0 %v10_v1, %s36_s0  ;;  %23 = vrot.lane.b32.xlu1 %v22_v2, %s37_s8  ;;  %v6_v4 = vld [vmem:[#allocation1] sm:$0x1]  }
   0xb   :  { %8 = vst.msk [vmem:[#allocation0] sm:$0x1] %vm7_vm0, %v6_v4  }
  0x12   :  { %17 = vrot.lane.b32.xlu0 %v16_v3, %s38_s9 }
  0x7c   :  { %v12_v5 = vpop.permute.xlu0 %11   ;;  %v24_v6 = vpop.permute.xlu1 %23  }
  0x7d   :  { %14 = vst.msk [vmem:[#allocation0] sm:$0x1] %vm13_vm1, %v12_v5  }
  0x84   :  { %v18_v7 = vpop.permute.xlu0 %17  }
  0x85   :  { %20 = vst.msk [vmem:[#allocation0] sm:$0x1] %vm19_vm2, %v18_v7  }
  0x86   :  { %26 = vst.msk [vmem:[#allocation0] sm:$0x1] %vm25_vm3, %v24_v6  }
  0x8d   :  { %v29_v8 = vld [vmem:[#allocation0] sm:$0x1] }
  0x8e   :  { %32 = vst [vmem:[%s56_s1] sm:$0x1] %v29_v8 }

// kernel: resnet_forward.1
= control target key start
LH: loop header
LB: loop body
LE: loop exit
PB: predicated region body
PF: predicated region fallthrough
CT: control target
= control target key end

     0   :  { %s509_s18 = smov 0   ;;  %s653_s0 = inlined_call_operand.vmem [shape: f32[64,128], index: 0, kind: input, shape index: {}, may-alias: {0,5}]   ;;  %s654_s1 = inlined_call_operand.vmem [shape: f32[128,128], index: 1, kind: input, shape index: {}]   ;;  %s655_s2 = inlined_call_operand.vmem [shape: f32[1,128], index: 2, kind: input, shape index: {}]   ;;  %s656_s3 = inlined_call_operand.vmem [shape: f32[128,128], index: 3, kind: input, shape index: {}]   ;;  %s657_s4 = inlined_call_operand.vmem [shape: f32[1,128], index: 4, kind: input, shape index: {}]   ;;  %s658_s5 = inlined_call_operand.vmem [shape: f32[64,128], index: 5, kind: output, shape index: {}, may-alias: {0,5}]  }
   0x1 LB: > { %s402_s19 = sadd.s32 4294967295, %s477_s18   ;;  %p406_p0 = scmp.ge.s32.totalorder %s477_s18, 1  ;;  %s477_s18 = sphi %s509_s18, %s15_s18  }
   0x2   : > { %p188_p1 = scmp.lt.s32.totalorder %s477_s18, 3 }
   0x4   : > { %p189_p2 = pnand %p406_p0, %p188_p1 }
   0x5   : > { %s407_s26 = sshll.u32 (!%p189_p2), %s402_s19, 2 }
   0x6   : > { %192 = sbr.rel (%p189_p2) target bundleno = 329 (0x149), region = 40  ;;  %p217_p3 = scmp.lt.s32.totalorder (!%p189_p2), %s407_s26, 7 }
   0xb   : > { %v247_v0 = vld [vmem:[%s654_s1 + $0x78] sm:$0xff]  ;;  %v246_v1 = vld [vmem:[%s654_s1 + $0x70] sm:$0xff]  ;;  %v245_v2 = vld [vmem:[%s654_s1 + $0x68] sm:$0xff]  ;;  %s660_s26 = smov (!%p217_p3, %s407_s26), 7 }
   0xc   : > { %413 = vmatpush.msra.mxu2 %v247_v0  ;;  %273 = vmatpush.msra.mxu0 %v247_v0  ;;  %v244_v3 = vld [vmem:[%s654_s1 + $0x60] sm:$0xff]  ;;  %v243_v4 = vld [vmem:[%s654_s1 + $0x58] sm:$0xff]  ;;  %v242_v5 = vld [vmem:[%s654_s1 + $0x50] sm:$0xff]  ;;  %s408_s19 = sshll.u32 %s660_s26, 3 }
   0xd   : > { %v263_v6 = vld [vmem:[%s656_s3 + $0x78] sm:$0xff]  ;;  %v262_v7 = vld [vmem:[%s656_s3 + $0x70] sm:$0xff]  ;;  %v241_v8 = vld [vmem:[%s654_s1 + $0x48] sm:$0xff]  ;;  %s570_s6 = scalar_lea.vmem %s653_s0, %s408_s19  ;;  %s226_s28 = scalar_lea.vmem %s658_s5, %s408_s19 }
   0xe   : > { %414 = vmatpush.msra.mxu2 %v246_v1  ;;  %274 = vmatpush.msra.mxu0 %v246_v1  ;;  %v261_v9 = vld [vmem:[%s656_s3 + $0x68] sm:$0xff]  ;;  %v240_v10 = vld [vmem:[%s654_s1 + $0x40] sm:$0xff]  ;;  %v239_v12 = vld [vmem:[%s654_s1 + $0x38] sm:$0xff] }
   0xf   : > { %309 = vmatpush.msra.mxu1 %v263_v6  ;;  %429 = vmatpush.msra.mxu3 %v263_v6  ;;  %v260_v11 = vld [vmem:[%s656_s3 + $0x60] sm:$0xff]  ;;  %v259_v13 = vld [vmem:[%s656_s3 + $0x58] sm:$0xff]  ;;  %v238_v14 = vld [vmem:[%s654_s1 + $0x30] sm:$0xff] }
  0x10   : > { %415 = vmatpush.msra.mxu2 %v245_v2  ;;  %275 = vmatpush.msra.mxu0 %v245_v2  ;;  %v258_v15 = vld [vmem:[%s656_s3 + $0x50] sm:$0xff]  ;;  %v237_v16 = vld [vmem:[%s654_s1 + $0x28] sm:$0xff]  ;;  %v236_v19 = vld [vmem:[%s654_s1 + $0x20] sm:$0xff] }
  0x11   : > { %310 = vmatpush.msra.mxu1 %v262_v7  ;;  %430 = vmatpush.msra.mxu3 %v262_v7  ;;  %v579_v17 = vld [vmem:[%s570_s6 + $0x10] sm:$0xff]  ;;  %v257_v18 = vld [vmem:[%s656_s3 + $0x48] sm:$0xff]  ;;  %v588_v20 = vld [vmem:[%s570_s6] sm:$0xff] }
  0x12   : > { %416 = vmatpush.msra.mxu2 %v244_v3  ;;  %276 = vmatpush.msra.mxu0 %v244_v3  ;;  %v256_v21 = vld [vmem:[%s656_s3 + $0x40] sm:$0xff]  ;;  %v235_v22 = vld [vmem:[%s654_s1 + $0x18] sm:$0xff]  ;;  %455 = vtanh.f32 %v579_v17  ;;  %v234_v24 = vld [vmem:[%s654_s1 + $0x10] sm:$0xff] }
  0x13   : > { %311 = vmatpush.msra.mxu1 %v261_v9  ;;  %431 = vmatpush.msra.mxu3 %v261_v9  ;;  %457 = vtanh.f32 %v588_v20  ;;  %v255_v23 = vld [vmem:[%s656_s3 + $0x38] sm:$0xff]  ;;  %v254_v25 = vld [vmem:[%s656_s3 + $0x30] sm:$0xff]  ;;  %v233_v26 = vld [vmem:[%s654_s1 + $0x8] sm:$0xff] }
  0x14   : > { %417 = vmatpush.msra.mxu2 %v243_v4  ;;  %277 = vmatpush.msra.mxu0 %v243_v4  ;;  %v611_v27 = vld [vmem:[%s570_s6 + $0x18] sm:$0xff]  ;;  %v253_v28 = vld [vmem:[%s656_s3 + $0x28] sm:$0xff]  ;;  %v232_v30 = vld [vmem:[%s654_s1] sm:$0xff] }
  0x15   : > { %312 = vmatpush.msra.mxu1 %v260_v11  ;;  %432 = vmatpush.msra.mxu3 %v260_v11  ;;  %v229_v31 = vld [vmem:[%s570_s6 + $0x8] sm:$0xff]  ;;  %459 = vtanh.f32 %v611_v27  ;;  %v252_v35 = vld [vmem:[%s656_s3 + $0x20] sm:$0xff]  ;;  %v251_v36 = vld [vmem:[%s656_s3 + $0x18] sm:$0xff] }
  0x16   : > { %418 = vmatpush.msra.mxu2 %v242_v5  ;;  %278 = vmatpush.msra.mxu0 %v242_v5  ;;  %461 = vtanh.f32 %v229_v31  ;;  %v250_v37 = vld [vmem:[%s656_s3 + $0x10] sm:$0xff]  ;;  %v249_v38 = vld [vmem:[%s656_s3 + $0x8] sm:$0xff]  ;;  %v248_v39 = vld [vmem:[%s656_s3] sm:$0xff] }
  0x17   : > { %313 = vmatpush.msra.mxu1 %v259_v13  ;;  %433 = vmatpush.msra.mxu3 %v259_v13  ;;  %v453_v40 = vld [vmem:[%s655_s2] ss:$0 sm:$0xff] }
  0x18   : > { %419 = vmatpush.msra.mxu2 %v241_v8  ;;  %279 = vmatpush.msra.mxu0 %v241_v8  ;;  %v456_v29 = vpop.eup %455  ;;  %v454_v53 = vld [vmem:[%s657_s4] ss:$0 sm:$0xff] }
  0x19   : > { %314 = vmatpush.msra.mxu1 %v258_v15  ;;  %434 = vmatpush.msra.mxu3 %v258_v15  ;;  %v458_v32 = vpop.eup %457 }
  0x1a   : > { %420 = vmatpush.msra.mxu2 %v240_v10  ;;  %280 = vmatpush.msra.mxu0 %v240_v10 }
  0x1b   : > { %315 = vmatpush.msra.mxu1 %v257_v18  ;;  %435 = vmatpush.msra.mxu3 %v257_v18  ;;  %v460_v33 = vpop.eup %459 }
  0x1c   : > { %421 = vmatpush.msra.mxu2 %v239_v12  ;;  %281 = vmatpush.msra.mxu0 %v239_v12  ;;  %v462_v34 = vpop.eup %461 }
  0x1d   : > { %316 = vmatpush.msra.mxu1 %v256_v21  ;;  %436 = vmatpush.msra.mxu3 %v256_v21 }
  0x1e   : > { %422 = vmatpush.msra.mxu2 %v238_v14  ;;  %282 = vmatpush.msra.mxu0 %v238_v14 }
  0x1f   : > { %317 = vmatpush.msra.mxu1 %v255_v23  ;;  %437 = vmatpush.msra.mxu3 %v255_v23 }
  0x20   : > { %423 = vmatpush.msra.mxu2 %v237_v16  ;;  %283 = vmatpush.msra.mxu0 %v237_v16 }
  0x21   : > { %318 = vmatpush.msra.mxu1 %v254_v25  ;;  %438 = vmatpush.msra.mxu3 %v254_v25 }
  0x22   : > { %424 = vmatpush.msra.mxu2 %v236_v19  ;;  %284 = vmatpush.msra.mxu0 %v236_v19 }
  0x23   : > { %319 = vmatpush.msra.mxu1 %v253_v28  ;;  %439 = vmatpush.msra.mxu3 %v253_v28 }
  0x24   : > { %425 = vmatpush.msra.mxu2 %v235_v22  ;;  %285 = vmatpush.msra.mxu0 %v235_v22 }
  0x25   : > { %320 = vmatpush.msra.mxu1 %v252_v35  ;;  %440 = vmatpush.msra.mxu3 %v252_v35 }
  0x26   : > { %426 = vmatpush.msra.mxu2 %v234_v24  ;;  %286 = vmatpush.msra.mxu0 %v234_v24 }
  0x27   : > { %321 = vmatpush.msra.mxu1 %v251_v36  ;;  %441 = vmatpush.msra.mxu3 %v251_v36 }
  0x28   : > { %427 = vmatpush.msra.mxu2 %v233_v26  ;;  %287 = vmatpush.msra.mxu0 %v233_v26 }
  0x29   : > { %322 = vmatpush.msra.mxu1 %v250_v37  ;;  %442 = vmatpush.msra.mxu3 %v250_v37 }
  0x2a   : > { %428 = vmatpush.msra.mxu2 %v232_v30  ;;  %288 = vmatpush.msra.mxu0 %v232_v30 }
  0x2b   : > { %295 = vmatmul.f32.vlgmr.msra.gmra.mxu2 %v456_v29  ;;  %289 = vmatmul.f32.vlgmr.msra.gmra.mxu0 %v458_v32 }
  0x2c   : > { %323 = vmatpush.msra.mxu1 %v249_v38  ;;  %443 = vmatpush.msra.mxu3 %v249_v38 }
  0x2e   : > { %324 = vmatpush.msra.mxu1 %v248_v39  ;;  %444 = vmatpush.msra.mxu3 %v248_v39 }
  0x33   : > { %298 = vmatmul.f32.gmra.mxu2 %v460_v33  ;;  %292 = vmatmul.f32.gmra.mxu0 %v462_v34 }
  0xa8   : > { %v290_v41 = vpop.f32.mrf.mxu0 }
  0xa9   : > { %v291_v42 = vadd.f32 %v453_v40, %v290_v41 }
  0xab   : > { %463 = vtanh.f32 %v291_v42 }
  0xae   : > { %v296_v43 = vpop.f32.mrf.mxu2 }
  0xaf   : > { %v297_v44 = vadd.f32 %v453_v40, %v296_v43 }
  0xb0   : > { %v293_v45 = vpop.f32.mrf.mxu0 }
  0xb1   : > { %v464_v46 = vpop.eup %463  ;;  %465 = vtanh.f32 %v297_v44  ;;  %v294_v47 = vadd.f32 %v453_v40, %v293_v45 }
  0xb2   : > { %325 = vmatmul.f32.vlgmr.msra.gmra.mxu1 %v464_v46 }
  0xb3   : > { %467 = vtanh.f32 %v294_v47 }
  0xb6   : > { %v299_v48 = vpop.f32.mrf.mxu2 }
  0xb7   : > { %v466_v49 = vpop.eup %465  ;;  %v300_v50 = vadd.f32 %v453_v40, %v299_v48 }
  0xb8   : > { %331 = vmatmul.f32.vlgmr.msra.gmra.mxu3 %v466_v49 }
  0xb9   : > { %v468_v51 = vpop.eup %467  ;;  %469 = vtanh.f32 %v300_v50 }
  0xba   : > { %328 = vmatmul.f32.gmra.mxu1 %v468_v51 }
  0xbf   : > { %v470_v52 = vpop.eup %469 }
  0xc0   : > { %334 = vmatmul.f32.gmra.mxu3 %v470_v52 }
 0x12f   : > { %v326_v54 = vpop.f32.mrf.mxu1 }
 0x130   : > { %v327_v55 = vadd.f32 %v454_v53, %v326_v54 }
 0x132   : > { %v338_v56 = vadd.f32 %v327_v55, %v588_v20 }
 0x134   : > { %342 = vst [vmem:[%s226_s28] sm:$0xff] %v338_v56 }
 0x137   : > { %v329_v57 = vpop.f32.mrf.mxu1 }
 0x138   : > { %v330_v58 = vadd.f32 %v454_v53, %v329_v57 }
 0x13a   : > { %v339_v59 = vadd.f32 %v330_v58, %v229_v31 }
 0x13b   : > { %v332_v60 = vpop.f32.mrf.mxu3 }
 0x13c   : > { %v333_v61 = vadd.f32 %v454_v53, %v332_v60  ;;  %343 = vst [vmem:[%s226_s28 + $0x8] sm:$0xff] %v339_v59 }
 0x13e   : > { %v340_v62 = vadd.f32 %v333_v61, %v579_v17 }
 0x140   : > { %344 = vst [vmem:[%s226_s28 + $0x10] sm:$0xff] %v340_v62 }
 0x143   : > { %v335_v63 = vpop.f32.mrf.mxu3 }
 0x144   : > { %v336_v0 = vadd.f32 %v454_v53, %v335_v63 }
 0x146   : > { %v341_v1 = vadd.f32 %v336_v0, %v611_v27 }
 0x148   : > { %345 = vst [vmem:[%s226_s28 + $0x18] sm:$0xff] %v341_v1 }
 0x149 PF: > { %s15_s18 = sadd.s32 1, %s477_s18  }
 0x14a   : > { %p12_p4 = scmp.ge.s32.totalorder %s15_s18, 4  }
 0x14c   :  { %14 = sbr.rel (!%p12_p4) target bundleno = 1 (0x1), region = 70 }

</bundles_post_ra>
